<compile_context>
chip_gen: v7x
topology: tpu7x:2x2x1
jax: 0.10.0
libtpu: 0.0.40
codegen_flags: <defaults>
</compile_context>

<pallas_src>
import functools

import jax
import jax.numpy as jnp
from jax.experimental import pallas as pl
from jax.experimental.pallas import tpu as pltpu

LN_EPS = 1e-5  # PyTorch nn.LayerNorm default


def _round_up(n, m):
    return ((n + m - 1) // m) * m


def _vmem_capacity_bytes():
    """Physical VMEM of the current chip; conservative fallback if the query fails."""
    try:
        return int(pltpu.get_tpu_info().vmem_capacity_bytes)
    except Exception:
        return 128 << 20  # v5e/v6e physical VMEM


def mlp_head_kernel(x_ref, w_ref, b_ref, o_ref):
    # x_ref: (TB, D)   w_ref: (D, O_pad) bf16 (gamma folded)   b_ref: (1, O_pad) f32 (beta folded)
    # o_ref: (TB, O_pad)
    x = x_ref[...].astype(jnp.float32)

    # LayerNorm statistics in f32 over the true feature width D (biased variance).
    mean = jnp.mean(x, axis=-1, keepdims=True)
    centered = x - mean
    var = jnp.mean(centered * centered, axis=-1, keepdims=True)
    xhat = centered * jax.lax.rsqrt(var + LN_EPS)

    # (x - mean)/sqrt(var+eps) @ (diag(gamma) W^T) + (beta W^T + bias): bf16 MXU, f32 accumulate.
    out = jnp.dot(xhat.astype(w_ref.dtype), w_ref[...],
                  preferred_element_type=jnp.float32)
    out = out + b_ref[...]
    o_ref[...] = out.astype(o_ref.dtype)


def prepare_params(gamma, beta, weight, bias, weight_dtype=jnp.bfloat16):
    """One-time parameter prep (outside the hot path).

    Folds LayerNorm affine into the linear layer and lane-pads the output columns:
      W' = diag(gamma) @ W^T   (shape (D, O_pad), bf16)
      b' = beta @ W^T + bias   (shape (1, O_pad), f32 -- added after f32 accumulation)
    O is padded to a multiple of 128 (256 when D is large enough to be MXU-bound on v6e/v7x)
    so kernel stores are lane-dense and the MXU runs at full width.
    """
    O, D = weight.shape
    lane_pad = 256 if D >= 512 else 128
    o_pad = _round_up(O, lane_pad)

    wt = weight.T.astype(jnp.float32)                                    # (D, O)
    w_fold = wt * gamma.reshape(D, 1).astype(jnp.float32)                # gamma into W rows
    b_fold = beta.reshape(1, D).astype(jnp.float32) @ wt \
        + bias.reshape(1, O).astype(jnp.float32)                         # beta into bias

    w_pad = jnp.zeros((D, o_pad), weight_dtype).at[:, :O].set(w_fold.astype(weight_dtype))
    b_pad = jnp.zeros((1, o_pad), jnp.float32).at[:, :O].set(b_fold)
    return w_pad, b_pad


@functools.partial(jax.jit, static_argnames=("out_dim", "block_b", "return_padded"))
def mlp_head(x, w_pad, b_pad, out_dim, block_b=None, return_padded=False):
    """x: (B, D); w_pad: (D, O_pad) bf16; b_pad: (1, O_pad) f32."""
    B, D = x.shape
    o_pad = w_pad.shape[1]

    xbytes = x.dtype.itemsize
    obytes = xbytes                      # output keeps x.dtype
    wbytes = w_pad.dtype.itemsize
    bbytes = b_pad.dtype.itemsize

    # Generation-aware VMEM budget: ~48 MiB on v7x (64 MiB per-TC), up to 96 MiB on v5e/v6e.
    cap = _vmem_capacity_bytes()
    budget = min(int(cap * 3 // 4), 96 << 20)

    # Resident (single-buffered) params vs streamed (double-buffered) x / out tiles.
    resident = D * o_pad * wbytes + o_pad * bbytes
    per_row = 2 * (D * xbytes + o_pad * obytes)
    max_rows_fit = max(8, (budget - resident) // max(per_row, 1))
    max_rows_fit = max(8, (max_rows_fit // 8) * 8)

    if block_b is None:
        # Guarantee >= 2 grid steps for B >= 16 so both v7x TensorCores get work.
        target = _round_up(-(-B // 2), 8) if B >= 16 else _round_up(B, 8)
        block_b = int(max(8, min(target, max_rows_fit, 2048)))
    block_b = int(min(block_b, _round_up(B, 8)))
    grid = (pl.cdiv(B, block_b),)

    vmem_need = 2 * block_b * (D * xbytes + o_pad * obytes) + resident
    vmem_limit = int(min(max(2 * vmem_need + (4 << 20), 16 << 20), budget))

    cost = pl.CostEstimate(
        flops=2 * B * D * o_pad + 7 * B * D,
        transcendentals=B,                       # one rsqrt per row
        bytes_accessed=(B * D * xbytes + D * o_pad * wbytes
                        + o_pad * bbytes + B * o_pad * obytes),
    )

    out = pl.pallas_call(
        mlp_head_kernel,
        out_shape=jax.ShapeDtypeStruct((B, o_pad), x.dtype),
        grid_spec=pltpu.PrefetchScalarGridSpec(
            num_scalar_prefetch=0,
            grid=grid,
            in_specs=[
                # Streamed batch tile (double-buffered by default).
                pl.BlockSpec((block_b, D), lambda i: (i, 0)),
                # Loop-invariant, VMEM-resident params: single-buffered.
                pl.BlockSpec((D, o_pad), lambda i: (0, 0),
                             pipeline_mode=pl.Buffered(1)),
                pl.BlockSpec((1, o_pad), lambda i: (0, 0),
                             pipeline_mode=pl.Buffered(1)),
            ],
            out_specs=pl.BlockSpec((block_b, o_pad), lambda i: (i, 0)),
        ),
        compiler_params=pltpu.CompilerParams(
            dimension_semantics=("parallel",),   # batch tiles split across TCs on v7x
            vmem_limit_bytes=vmem_limit,
        ),
        cost_estimate=cost,
    )(x, w_pad, b_pad)

    if return_padded:
        # Let the consumer slice/fuse; avoids an extra full-output HBM round trip for large O.
        return out
    return out[:, :out_dim]


def mlp_head_ref(x, gamma, beta, weight, bias):
    xf = x.astype(jnp.float32)
    mean = jnp.mean(xf, axis=-1, keepdims=True)
    var = jnp.mean((xf - mean) ** 2, axis=-1, keepdims=True)
    xn = (xf - mean) / jnp.sqrt(var + LN_EPS)
    y = xn * gamma + beta
    return (y @ weight.T + bias).astype(x.dtype)


if __name__ == "__main__":
    # Small shapes consistent with the module: vec_length=32, out_dim=16, batch=8.
    B, D, O = 8, 32, 16
    key = jax.random.PRNGKey(0)
    kx, kw, kb, kg, kbt = jax.random.split(key, 5)

    x = jax.random.normal(kx, (B, D), dtype=jnp.float32)

    # Deterministic synthetic parameters (non-trivial gamma/beta to exercise the folding).
    gamma = 1.0 + 0.1 * jax.random.normal(kg, (D,), dtype=jnp.float32)
    beta = 0.1 * jax.random.normal(kbt, (D,), dtype=jnp.float32)
    weight = jax.random.normal(kw, (O, D), dtype=jnp.float32) * 0.05   # Linear weight (O, D)
    bias = jax.random.normal(kb, (O,), dtype=jnp.float32) * 0.05       # Linear bias (O,)

    # One-time param prep (fold gamma/beta, transpose, lane-pad, cast to bf16).
    w_pad, b_pad = prepare_params(gamma, beta, weight, bias)

    out = mlp_head(x, w_pad, b_pad, O)
    out = jax.block_until_ready(out)

    ref = mlp_head_ref(x, gamma, beta, weight, bias)
    assert out.shape == (B, O)
    # bf16 MXU operands with f32 accumulation -> loosen tolerance vs the f32 reference.
    assert jnp.allclose(out, ref, atol=2e-2, rtol=2e-2), "mismatch vs reference"

    print("KERNEL_OK")
</pallas_src>

<mosaic_0001>
module attributes {stable_mosaic.version = 11 : i64} {
  func.func @mlp_head_kernel(%arg0: i32, %arg1: memref<8x32xf32, #tpu.memory_space<vmem>>, %arg2: memref<32x128xbf16, #tpu.memory_space<vmem>>, %arg3: memref<1x128xf32, #tpu.memory_space<vmem>>, %arg4: memref<8x128xf32, #tpu.memory_space<vmem>>) attributes {dimension_semantics = [#tpu.dimension_semantics<parallel>], iteration_bounds = array<i64: 1>, scalar_prefetch = 0 : i64, scratch_operands = 0 : i64, tpu.core_type = #tpu.core_type<tc>, window_params = [{transform_indices = @transform_0, window_bounds = array<i64: 8, 32>}, {pipeline_mode = #tpu.pipeline_mode<synchronous>, transform_indices = @transform_1, window_bounds = array<i64: 32, 128>}, {pipeline_mode = #tpu.pipeline_mode<synchronous>, transform_indices = @transform_2, window_bounds = array<i64: 1, 128>}, {transform_indices = @transform_3, window_bounds = array<i64: 8, 128>}]} {
    %c0 = arith.constant 0 : index
    %c0_0 = arith.constant 0 : index
    %0 = vector.load %arg1[%c0, %c0_0] : memref<8x32xf32, #tpu.memory_space<vmem>>, vector<8x32xf32>
    %cst = arith.constant dense<0.000000e+00> : vector<8xf32>
    %1 = vector.multi_reduction <add>, %0, %cst [1] : vector<8x32xf32> to vector<8xf32>
    %2 = vector.shape_cast %1 : vector<8xf32> to vector<8x1xf32>
    %cst_1 = arith.constant 3.200000e+01 : f32
    %3 = vector.broadcast %cst_1 : f32 to vector<8x1xf32>
    %4 = arith.divf %2, %3 : vector<8x1xf32>
    %5 = vector.broadcast %4 : vector<8x1xf32> to vector<8x32xf32>
    %6 = arith.subf %0, %5 : vector<8x32xf32>
    %7 = arith.mulf %6, %6 : vector<8x32xf32>
    %cst_2 = arith.constant dense<0.000000e+00> : vector<8xf32>
    %8 = vector.multi_reduction <add>, %7, %cst_2 [1] : vector<8x32xf32> to vector<8xf32>
    %9 = vector.shape_cast %8 : vector<8xf32> to vector<8x1xf32>
    %cst_3 = arith.constant 3.200000e+01 : f32
    %10 = vector.broadcast %cst_3 : f32 to vector<8x1xf32>
    %11 = arith.divf %9, %10 : vector<8x1xf32>
    %cst_4 = arith.constant 9.99999974E-6 : f32
    %12 = vector.broadcast %cst_4 : f32 to vector<8x1xf32>
    %13 = arith.addf %11, %12 : vector<8x1xf32>
    %14 = math.rsqrt %13 : vector<8x1xf32>
    %15 = vector.broadcast %14 : vector<8x1xf32> to vector<8x32xf32>
    %16 = arith.mulf %6, %15 : vector<8x32xf32>
    %17 = arith.truncf %16 : vector<8x32xf32> to vector<8x32xbf16>
    %c0_5 = arith.constant 0 : index
    %c0_6 = arith.constant 0 : index
    %18 = vector.load %arg2[%c0_5, %c0_6] : memref<32x128xbf16, #tpu.memory_space<vmem>>, vector<32x128xbf16>
    %cst_7 = arith.constant dense<0.000000e+00> : vector<8x128xf32>
    %19 = tpu.matmul %17, %18, %cst_7 {dimension_numbers = #tpu.dot_dimension_numbers<[1], [0], [0], [1], [0, 0, 1, 1], [], []>} : vector<8x32xbf16>, vector<32x128xbf16>, vector<8x128xf32> -> vector<8x128xf32>
    %c0_8 = arith.constant 0 : index
    %c0_9 = arith.constant 0 : index
    %20 = vector.load %arg3[%c0_8, %c0_9] : memref<1x128xf32, #tpu.memory_space<vmem>>, vector<1x128xf32>
    %21 = vector.broadcast %20 : vector<1x128xf32> to vector<8x128xf32>
    %22 = arith.addf %19, %21 : vector<8x128xf32>
    %c0_10 = arith.constant 0 : index
    %c0_11 = arith.constant 0 : index
    %23 = vector.load %arg4[%c0_10, %c0_11] : memref<8x128xf32, #tpu.memory_space<vmem>>, vector<8x128xf32>
    tpu.vector_store %arg4[%c0_10, %c0_11], %22 {strides = array<i32>} : memref<8x128xf32, #tpu.memory_space<vmem>>, vector<8x128xf32>,
    return
  }
  func.func @transform_0(%arg0: i32) -> (i32, i32) {
    %c0_i32 = arith.constant 0 : i32
    %c0_i32_0 = arith.constant 0 : i32
    return %arg0, %c0_i32 : i32, i32
  }
  func.func @transform_1(%arg0: i32) -> (i32, i32) {
    %c0_i32 = arith.constant 0 : i32
    %c0_i32_0 = arith.constant 0 : i32
    %c0_i32_1 = arith.constant 0 : i32
    return %c0_i32, %c0_i32_0 : i32, i32
  }
  func.func @transform_2(%arg0: i32) -> (i32, i32) {
    %c0_i32 = arith.constant 0 : i32
    %c0_i32_0 = arith.constant 0 : i32
    %c0_i32_1 = arith.constant 0 : i32
    return %c0_i32, %c0_i32_0 : i32, i32
  }
  func.func @transform_3(%arg0: i32) -> (i32, i32) {
    %c0_i32 = arith.constant 0 : i32
    %c0_i32_0 = arith.constant 0 : i32
    return %arg0, %c0_i32 : i32, i32
  }
}

</mosaic_0001>

<bundles_post_ra>
// kernel: mlp_head.1
= control target key start
LH: loop header
LB: loop body
LE: loop exit
PB: predicated region body
PF: predicated region fallthrough
CT: control target
= control target key end

     0   :  { %8 = vsyncpa [#allocation3], 0  ;;  %s316_s0 = inlined_call_operand.hbm [shape: f32[8,32], index: 0, kind: input, shape index: {}]   ;;  %s317_s1 = inlined_call_operand.hbm [shape: bf16[32,128], index: 1, kind: input, shape index: {}]   ;;  %s318_s2 = inlined_call_operand.vmem [shape: f32[1,128], index: 2, kind: input, shape index: {}]   ;;  %s319_s3 = inlined_call_operand.hbm [shape: f32[8,128], index: 3, kind: output, shape index: {}]  }
   0x1   :  { %9 = vsyncpa [#allocation6], 0 }
   0x2   :  { %10 = vsyncpa [#allocation4], 0  ;;  %s240_s12 = smov [#allocation2]   ;;  %s241_s14 = smov [#allocation5]  }
   0x3   :  { %s17_s13 = sshll.u32 %s240_s12, 4  ;;  %s26_s15 = sshll.u32 %s241_s14, 4  ;;  %s18_s13 = int_to_ptr.vmem [resolvable:$true] %s17_s13  ;;  %s267_s15 = int_to_ptr.vmem [resolvable:$true] %s26_s15 }
   0x4   :  { %s168_s18 = scalar_lea.hbm %s316_s0, 128 }
   0x5   :  { %p169_p0 = scmp.ne.s32.totalorder %s316_s0, %s168_s18  ;;  %p172_p1 = scmp.lt.u32.totalorder %s168_s18, %s316_s0 }
   0x7   :  { %p174_p2 = pnand %p172_p1, %p169_p0 }
   0x9   :  { %177 = shalt.err (!%p174_p2)
}
   0xa   :  { %s178_s23 = scalar_lea.vmem %s18_s13, 128  ;;  %p183_p4 = scmp.lt.s32.totalorder %s18_s13, %s18_s13 }
   0xb   :  { %p179_p3 = scmp.ne.s32.totalorder %s18_s13, %s178_s23  ;;  %p184_p5 = scmp.lt.s32.totalorder %s178_s23, %s178_s23 }
   0xd   :  { %p185_p6 = por %p184_p5, %p183_p4 }
   0xf   :  { %p186_p7 = pnand %p185_p6, %p179_p3 }
  0x11   :  { %189 = shalt.err (!%p186_p7)
}
  0x12   :  { %20 = dma.hbm_to_vmem [thread:$0]  %s316_s0, 128, %s18_s13, [#allocation3]  }
  0x13   :  { %s190_s28 = scalar_lea.hbm %s317_s1, 256 }
  0x14   :  { %p191_p8 = scmp.ne.s32.totalorder %s317_s1, %s190_s28  ;;  %p194_p9 = scmp.lt.u32.totalorder %s190_s28, %s317_s1 }
  0x16   :  { %p196_p10 = pnand %p194_p9, %p191_p8 }
  0x18   :  { %199 = shalt.err (!%p196_p10)
}
  0x19   :  { %s200_s6 = scalar_lea.vmem %s267_s15, 256  ;;  %p205_p12 = scmp.lt.s32.totalorder %s267_s15, %s267_s15 }
  0x1a   :  { %p201_p11 = scmp.ne.s32.totalorder %s267_s15, %s200_s6  ;;  %p206_p13 = scmp.lt.s32.totalorder %s200_s6, %s200_s6 }
  0x1c   :  { %p207_p0 = por %p206_p13, %p205_p12 }
  0x1e   :  { %p208_p1 = pnand %p207_p0, %p201_p11 }
  0x20   :  { %211 = shalt.err (!%p208_p1)
}
  0x21   :  { %s242_s0 = smov 64   ;;  %s243_s7 = smov 4  }
  0x22   :  { %32 = dma.hbm_to_vmem [thread:$0]  %s317_s1, 256, %s267_s15, [#allocation6], %s242_s0, %s242_s0, %s243_s7  }
  0x23   :  { %234 = dma.done.wait [#allocation3], 128  }
  0x24   :  { %235 = vsyncadd [#allocation3], 4294967168 }
  0x25   :  { %236 = dma.done.wait [#allocation6], 256  }
  0x26   :  { %237 = vsyncadd [#allocation6], 4294967040  ;;  %vm43_vm0 = vcmask 261120   ;;  %v42_v0 = vld [vmem:[#allocation2] sm:$0xff]  ;;  %v164_v7 = vld [vmem:[#allocation5] sm:$0xff]   ;;  %v244_v8 = vmov 0.0  }
  0x27   :  { %v44_v1 = vsel %vm43_vm0, %v42_v0, 0.0  ;;  %149 = vmatprep.subr.bf16.mxu0 %v244_v8  ;;  %vm245_vm1 = vmmov 0   ;;  %v165_v9 = vld [vmem:[#allocation5 + $0x8] sm:$0xff]   ;;  %v142_v16 = vld [vmem:[%s318_s2] ss:$0 sm:$0xff]  ;;  %s246_s11 = smov [#allocation7]  }
  0x28   :  { %45 = vadd.xlane.f32.xlu0 %v44_v1  ;;  %153 = vmatprep.mubr.msk.bf16.mxu0 %vm245_vm1, %v244_v8  ;;  %s132_s12 = sshll.u32 %s246_s11, 4  ;;  %s133_s12 = int_to_ptr.vmem [resolvable:$true] %s132_s12 }
  0x29   :  { %150 = vmatpush3.bf16.msra.mxu0 %v164_v7  ;;  %s212_s13 = scalar_lea.vmem %s133_s12, 128  ;;  %p217_p3 = scmp.lt.s32.totalorder %s133_s12, %s133_s12 }
  0x2a   :  { %151 = vmatprep.subr.bf16.mxu0 %v244_v8  ;;  %p213_p2 = scmp.ne.s32.totalorder %s133_s12, %s212_s13  ;;  %p218_p4 = scmp.lt.s32.totalorder %s212_s13, %s212_s13 }
  0x2c   :  { %p219_p5 = por %p218_p4, %p217_p3 }
  0x2d   :  { %152 = vmatpush3.bf16.msra.mxu0 %v165_v9 }
  0x2e   :  { %p220_p6 = pnand %p219_p5, %p213_p2 }
  0xb5   :  { %v46_v2 = vpop.xlane.xlu0 %45 }
  0xb6   :  { %v48_v3 = vmul.f32 0.03125, %v46_v2 }
  0xb8   :  { %v49_v4 = vsub.f32 %v42_v0, %v48_v3 }
  0xba   :  { %v50_v5 = vmul.f32 %v49_v4, %v49_v4 }
  0xbc   :  { %v51_v6 = vsel %vm43_vm0, %v50_v5, 0.0 }
  0xbd   :  { %52 = vadd.xlane.f32.xlu0 %v51_v6 }
 0x14a   :  { %v53_v10 = vpop.xlane.xlu0 %52 }
 0x14b   :  { %v54_v11 = vmul.f32 0.03125, %v53_v10 }
 0x14d   :  { %v55_v12 = vadd.f32 1e-05, %v54_v11 }
 0x14f   :  { %166 = vrsqrt.f32 %v55_v12 }
 0x159   :  { %v167_v13 = vpop.eup %166 }
 0x15a   :  { %v57_v14 = vmul.f32 %v167_v13, %v49_v4 }
 0x15c   :  { %v58_v15 = vpack.c.bf16 %v57_v14, %v57_v14 }
 0x15e   :  { %154 = vmatmul.mubr.msk.bf16.vlgmr.msra.gmra.mrb[0].mxu0 %vm43_vm0, %v58_v15 }
 0x231   :  { %v119_v17 = vpop.f32.mrb[0].mxu0 }
 0x232   :  { %v120_v18 = vadd.f32 %v142_v16, %v119_v17  ;;  %v155_v19 = vpop.f32.mrb[1].mxu0 }
 0x233   :  { %v122_v20 = vpop.f32.mrb[2].mxu0 }
 0x234   :  { %125 = vst [vmem:[#allocation7] sm:$0xff] %v120_v18  ;;  %v156_v21 = vpop.f32.mrb[3].mxu0 }
 0x235   :  { %223 = shalt.err (!%p220_p6)
}
 0x236   :  { %s224_s2 = scalar_lea.hbm %s319_s3, 128 }
 0x237   :  { %p225_p7 = scmp.ne.s32.totalorder %s319_s3, %s224_s2  ;;  %p228_p8 = scmp.lt.u32.totalorder %s224_s2, %s319_s3 }
 0x239   :  { %p230_p9 = pnand %p228_p8, %p225_p7 }
 0x23b   :  { %233 = shalt.err (!%p230_p9)
}
 0x23c   :  { %135 = dma.vmem_to_hbm [thread:$0]  %s133_s12, 128, %s319_s3, [#allocation4]  }
 0x23d   :  { %238 = dma.done.wait [#allocation4], 128  }
 0x23e   :  { %239 = vsyncadd [#allocation4], 4294967168 }
 0x23f   :  { %139 = vsyncpa [#allocation3], 1 }
 0x240   :  { %140 = vsyncpa [#allocation6], 1 }
 0x241   :  { %141 = vsyncpa [#allocation4], 1 }

</bundles_post_ra>
